<compile_context>
chip_gen: v5e
topology: v5e:2x2
jax: 0.10.0
libtpu: 0.0.40
codegen_flags: <defaults>
</compile_context>

<pallas_src>
import math

import jax
import jax.numpy as jnp
from jax.experimental import pallas as pl
from jax.experimental.pallas import tpu as pltpu

_SQRT_2_OVER_PI = math.sqrt(2.0 / math.pi)
_LANES = 128


def _gelu_kernel(x_ref, o_ref):
    # Compute in f32 regardless of storage dtype (free under the DMA bound),
    # cast back on the store.  Single tanh -> EUP slot; everything else VPU.
    x = x_ref[...].astype(jnp.float32)
    inner = _SQRT_2_OVER_PI * (x + 0.044715 * (x * x * x))
    o_ref[...] = (0.5 * x * (1.0 + jnp.tanh(inner))).astype(o_ref.dtype)


def _gelu_jnp(x: jax.Array) -> jax.Array:
    """Fused fallback for tiny or non-128-divisible tensors (f32 internally)."""
    xf = x.astype(jnp.float32)
    y = 0.5 * xf * (1.0 + jnp.tanh(_SQRT_2_OVER_PI * (xf + 0.044715 * xf * xf * xf)))
    return y.astype(x.dtype)


def _round_up(x: int, m: int) -> int:
    return ((x + m - 1) // m) * m


def _round_down(x: int, m: int) -> int:
    return (x // m) * m


def _choose_cols(total: int):
    """Largest multiple of 128 (<= 1024) that divides `total` exactly, else None."""
    c = 1024
    while c >= _LANES:
        if total % c == 0:
            return c
        c -= _LANES
    return None


def _hw_params():
    """(target_block_bytes, vmem_limit_bytes, multi_core) per TPU generation."""
    vmem_cap = 128 << 20
    try:
        info = pltpu.get_tpu_info()
        vmem_cap = int(getattr(info, "vmem_capacity_bytes", vmem_cap))
    except Exception:
        pass
    if vmem_cap <= (80 << 20):
        # v7x: 64 MiB VMEM per TC, 2 TensorCores, ~3.2 TB/s HBM.
        # Bigger blocks amortize the ~0.35us per-step overhead; 4 x 6 MiB
        # buffers fit comfortably under a 48 MiB scoped limit (< 64 physical).
        return 6 << 20, 48 << 20, True
    # v5e / v6e: 128 MiB physical VMEM, single TensorCore.
    return 4 << 20, 48 << 20, False


def _choose_tile_rows(rows: int, cols: int, itemsize: int,
                      target_block_bytes: int, multi_core: bool) -> int:
    """Sublane-aligned row tile; balanced, even step count on multi-core parts."""
    sub = {1: 32, 2: 16}.get(itemsize, 8)   # rows per vreg sublane group
    if rows <= sub:
        return rows                          # full-extent block is always legal

    raw = max(sub, target_block_bytes // (cols * itemsize))
    if raw >= rows:
        # Whole slab fits in one block.
        if multi_core:
            # Split into two balanced halves (round UP to the sublane multiple
            # so we get exactly 2 steps, not 3) so both TCs get work.
            half = _round_up(pl.cdiv(rows, 2), sub)
            if half < rows:
                return half
        return rows

    tile = _round_down(raw, sub)
    if multi_core:
        steps = pl.cdiv(rows, tile)
        if steps % 2 == 1 and steps < 8:
            # Nudge to an even step count so the 2 TCs stay balanced.
            nudged = _round_up(pl.cdiv(rows, steps + 1), sub)
            if sub <= nudged <= tile and pl.cdiv(rows, nudged) % 2 == 0:
                tile = nudged
    return tile


def gelu_pallas(x: jax.Array, *, min_pallas_bytes: int = 1 << 20,
                donate: bool = False) -> jax.Array:
    """Tanh-approx GELU via a lane-dense Pallas TPU kernel.

    Falls back to fused jnp for tensors smaller than `min_pallas_bytes` or whose
    element count has no 128-aligned divisor (avoids any pad/slice HBM passes).
    Set `donate=True` only if the caller actually donates `x` (buffer reuse).
    """
    total = x.size
    if total == 0:
        return x

    itemsize = x.dtype.itemsize
    cols = _choose_cols(total)
    if cols is None or total * itemsize < min_pallas_bytes:
        return _gelu_jnp(x)

    orig_shape = x.shape
    rows = total // cols
    x2 = x.reshape(rows, cols)

    target_bytes, vmem_limit, multi_core = _hw_params()
    tile_r = _choose_tile_rows(rows, cols, itemsize, target_bytes, multi_core)
    grid = (pl.cdiv(rows, tile_r),)          # ragged last block handled by Pallas

    extra = {}
    if donate:
        # Caller promises not to reuse x: halves peak HBM footprint.
        extra["input_output_aliases"] = {0: 0}

    out2 = pl.pallas_call(
        _gelu_kernel,
        out_shape=jax.ShapeDtypeStruct((rows, cols), x.dtype),
        grid_spec=pltpu.PrefetchScalarGridSpec(
            num_scalar_prefetch=0,
            grid=grid,
            in_specs=[pl.BlockSpec((tile_r, cols), lambda i: (i, 0))],
            out_specs=pl.BlockSpec((tile_r, cols), lambda i: (i, 0)),
        ),
        compiler_params=pltpu.CompilerParams(
            dimension_semantics=("parallel",),
            vmem_limit_bytes=vmem_limit,
        ),
        **extra,
    )(x2)

    return out2.reshape(orig_shape)


def gelu_ref(x: jax.Array) -> jax.Array:
    """Pure-JAX reference mirroring the PyTorch forward (f32 math, cast back)."""
    xf = x.astype(jnp.float32)
    y = 0.5 * xf * (1.0 + jnp.tanh(_SQRT_2_OVER_PI * (xf + 0.044715 * xf ** 3)))
    return y.astype(x.dtype)


if __name__ == "__main__":
    key = jax.random.PRNGKey(0)

    # NCHW activation shape consistent with the conv-style ProphetNet usage.
    x = jax.random.normal(key, (2, 4, 16, 16), dtype=jnp.float32)

    # Force the Pallas path for the small demo shape (the default wrapper
    # bypasses Pallas below ~1 MiB and lets XLA fuse the elementwise op).
    y = jax.block_until_ready(gelu_pallas(x, min_pallas_bytes=0))
    assert y.shape == x.shape and y.dtype == x.dtype
    assert jnp.allclose(y, gelu_ref(x), atol=1e-5, rtol=1e-5), "f32 mismatch"

    # bf16 input: kernel computes in f32 internally, stores bf16.
    xb = x.astype(jnp.bfloat16)
    yb = jax.block_until_ready(gelu_pallas(xb, min_pallas_bytes=0))
    assert yb.dtype == jnp.bfloat16
    assert jnp.allclose(yb.astype(jnp.float32), gelu_ref(xb).astype(jnp.float32),
                        atol=2e-2, rtol=2e-2), "bf16 mismatch"

    # Default path: tiny / non-128-divisible tensors take the fused jnp route.
    xs = jax.random.normal(jax.random.PRNGKey(1), (3, 5, 7), dtype=jnp.float32)
    ys = jax.block_until_ready(gelu_pallas(xs))
    assert jnp.allclose(ys, gelu_ref(xs), atol=1e-5, rtol=1e-5), "fallback mismatch"

    # Slightly larger case with a non-power-of-two row count to exercise the
    # multi-step / ragged-last-block grid path.
    xl = jax.random.normal(jax.random.PRNGKey(2), (6, 8, 41, 128), dtype=jnp.float32)
    yl = jax.block_until_ready(gelu_pallas(xl, min_pallas_bytes=0))
    assert jnp.allclose(yl, gelu_ref(xl), atol=1e-5, rtol=1e-5), "ragged mismatch"

    print("KERNEL_OK")
</pallas_src>

<mosaic_0001>
module attributes {stable_mosaic.version = 11 : i64} {
  func.func @_gelu_kernel(%arg0: i32, %arg1: memref<2x1024xf32, #tpu.memory_space<vmem>>, %arg2: memref<2x1024xf32, #tpu.memory_space<vmem>>) attributes {dimension_semantics = [#tpu.dimension_semantics<parallel>], iteration_bounds = array<i64: 1>, scalar_prefetch = 0 : i64, scratch_operands = 0 : i64, tpu.core_type = #tpu.core_type<tc>, window_params = [{transform_indices = @transform_0, window_bounds = array<i64: 2, 1024>}, {transform_indices = @transform_1, window_bounds = array<i64: 2, 1024>}]} {
    %c0 = arith.constant 0 : index
    %c0_0 = arith.constant 0 : index
    %0 = vector.load %arg1[%c0, %c0_0] : memref<2x1024xf32, #tpu.memory_space<vmem>>, vector<2x1024xf32>
    %1 = arith.mulf %0, %0 : vector<2x1024xf32>
    %2 = arith.mulf %1, %0 : vector<2x1024xf32>
    %cst = arith.constant 4.471500e-02 : f32
    %3 = vector.broadcast %cst : f32 to vector<2x1024xf32>
    %4 = arith.mulf %3, %2 : vector<2x1024xf32>
    %5 = arith.addf %0, %4 : vector<2x1024xf32>
    %cst_1 = arith.constant 0.797884583 : f32
    %6 = vector.broadcast %cst_1 : f32 to vector<2x1024xf32>
    %7 = arith.mulf %6, %5 : vector<2x1024xf32>
    %cst_2 = arith.constant 5.000000e-01 : f32
    %8 = vector.broadcast %cst_2 : f32 to vector<2x1024xf32>
    %9 = arith.mulf %8, %0 : vector<2x1024xf32>
    %10 = math.tanh %7 : vector<2x1024xf32>
    %cst_3 = arith.constant 1.000000e+00 : f32
    %11 = vector.broadcast %cst_3 : f32 to vector<2x1024xf32>
    %12 = arith.addf %11, %10 : vector<2x1024xf32>
    %13 = arith.mulf %9, %12 : vector<2x1024xf32>
    %c0_4 = arith.constant 0 : index
    %c0_5 = arith.constant 0 : index
    %14 = vector.load %arg2[%c0_4, %c0_5] : memref<2x1024xf32, #tpu.memory_space<vmem>>, vector<2x1024xf32>
    tpu.vector_store %arg2[%c0_4, %c0_5], %13 {strides = array<i32>} : memref<2x1024xf32, #tpu.memory_space<vmem>>, vector<2x1024xf32>,
    return
  }
  func.func @transform_0(%arg0: i32) -> (i32, i32) {
    %c0_i32 = arith.constant 0 : i32
    %c0_i32_0 = arith.constant 0 : i32
    return %arg0, %c0_i32 : i32, i32
  }
  func.func @transform_1(%arg0: i32) -> (i32, i32) {
    %c0_i32 = arith.constant 0 : i32
    %c0_i32_0 = arith.constant 0 : i32
    return %arg0, %c0_i32 : i32, i32
  }
}

</mosaic_0001>

<bundles_post_ra>
// kernel: tpu_custom_call.1
= control target key start
LH: loop header
LB: loop body
LE: loop exit
PB: predicated region body
PF: predicated region fallthrough
CT: control target
= control target key end

     0   :  { %6 = vsyncpa [#allocation3], 0  ;;  %s138_s0 = inlined_call_operand.hbm [shape: f32[2,1024], index: 0, kind: input, shape index: {}]   ;;  %s139_s1 = inlined_call_operand.hbm [shape: f32[2,1024], index: 1, kind: output, shape index: {}]  }
   0x1   :  { %7 = vsyncpa [#allocation4], 0  ;;  %s13_s8 = sshll.u32 %s138_s0, 4  ;;  %s120_s9 = smov [#allocation2]   ;;  %s14_s8 = int_to_ptr.hbm [resolvable:$true] %s13_s8 }
   0x2   :  { %s15_s10 = sshll.u32 %s120_s9, 4  ;;  %s16_s10 = int_to_ptr.vmem [resolvable:$true] %s15_s10 }
   0x3   :  { %18 = dma.hbm_to_vmem [thread:$0]  %s14_s8, 256, %s16_s10, [#allocation3]  }
   0x4   :  { %116 = dma.done.wait [#allocation3], 256  }
   0x5   :  { %117 = vsyncadd [#allocation3], 4294967040  ;;  %v23_v0 = vld [vmem:[#allocation2] sm:$0xff]  ;;  %v24_v1 = vld [vmem:[#allocation2 + $0x8] sm:$0xff]  ;;  %s121_s0 = smov [#allocation5]   ;;  %s52_s14 = sshll.u32 %s139_s1, 4  ;;  %s53_s14 = int_to_ptr.hbm [resolvable:$true] %s52_s14 }
   0x6   :  { %v25_v2 = vmul.f32 %v23_v0, %v23_v0  ;;  %v26_v3 = vmul.f32 %v24_v1, %v24_v1  ;;  %v35_v12 = vmul.f32 0.5, %v23_v0  ;;  %v36_v14 = vmul.f32 0.5, %v24_v1  ;;  %s50_s11 = sshll.u32 %s121_s0, 4  ;;  %s51_s11 = int_to_ptr.vmem [resolvable:$true] %s50_s11 }
   0x8   :  { %v27_v4 = vmul.f32 %v25_v2, %v23_v0  ;;  %v28_v5 = vmul.f32 %v26_v3, %v24_v1 }
   0xa   :  { %v29_v6 = vmul.f32 0.044715, %v27_v4  ;;  %v30_v7 = vmul.f32 0.044715, %v28_v5 }
   0xc   :  { %v31_v8 = vadd.f32 %v29_v6, %v23_v0  ;;  %v32_v9 = vadd.f32 %v30_v7, %v24_v1 }
   0xe   :  { %v33_v10 = vmul.f32 0.7978846, %v31_v8  ;;  %v34_v11 = vmul.f32 0.7978846, %v32_v9 }
  0x10   :  { %64 = vtanh.f32 %v33_v10 }
  0x11   :  { %66 = vtanh.f32 %v34_v11 }
  0x16   :  { %v65_v13 = vpop.eup %64 }
  0x17   :  { %v67_v15 = vpop.eup %66  ;;  %v39_v16 = vadd.f32 1.0, %v65_v13 }
  0x18   :  { %v40_v17 = vadd.f32 1.0, %v67_v15 }
  0x19   :  { %v41_v18 = vmul.f32 %v39_v16, %v35_v12 }
  0x1a   :  { %v42_v19 = vmul.f32 %v40_v17, %v36_v14 }
  0x1b   :  { %43 = vst [vmem:[#allocation5] sm:$0xff] %v41_v18 }
  0x1c   :  { %44 = vst [vmem:[#allocation5 + $0x8] sm:$0xff] %v42_v19 }
  0x1d   :  { %55 = dma.vmem_to_hbm [thread:$0]  %s51_s11, 256, %s53_s14, [#allocation4]  }
  0x1e   :  { %118 = dma.done.wait [#allocation4], 256  }
  0x1f   :  { %119 = vsyncadd [#allocation4], 4294967040 }
  0x20   :  { %60 = vsyncpa [#allocation3], 1 }
  0x21   :  { %61 = vsyncpa [#allocation4], 1 }

</bundles_post_ra>
